<compile_context>
chip_gen: v5e
topology: v5e:2x2
jax: 0.10.0
libtpu: 0.0.40
codegen_flags: <defaults>
</compile_context>

<pallas_src>
import functools

import jax
import jax.numpy as jnp
from jax import lax
from jax.experimental import pallas as pl
from jax.experimental.pallas import tpu as pltpu

LANE = 128          # lane width (last dim)
SUBLANE_BF16 = 16   # sublane packing granularity for bf16 tiles


def _round_up(x, m):
    return ((x + m - 1) // m) * m


def _tpu_generation():
    """Best-effort TPU generation detection (5 / 6 / 7, 0 if unknown)."""
    try:
        kind = jax.devices()[0].device_kind.lower()
    except Exception:
        return 0
    for g in (5, 6, 7):
        if f"v{g}" in kind:
            return g
    if "tpu7" in kind or "7x" in kind:
        return 7
    return 0


def _vmem_budget_bytes(gen):
    """~75% of physical VMEM (headroom for compiler scratch / double buffers)."""
    phys = None
    try:
        phys = int(pltpu.get_tpu_info().vmem_capacity_bytes)
    except Exception:
        phys = None
    if not phys:
        # Conservative fallbacks: v7x has 64 MiB/TC, v5e/v6e have 128 MiB.
        phys = (64 << 20) if gen in (0, 7) else (128 << 20)
    return int(phys * 3 // 4)


# ----------------------------------------------------------------------------
# Kernels
# ----------------------------------------------------------------------------

def _mlp_kernel_resident(x_ref, wi_ref, bi_ref, *rest, num_hidden_layers, tanh_dtype):
    """All weights VMEM-resident; grid = (num_batch_tiles,). Hidden layers unrolled in-kernel."""
    if num_hidden_layers > 0:
        wh_ref, bh_ref, wo_ref, bo_ref, o_ref = rest
    else:
        wo_ref, bo_ref, o_ref = rest

    act_dtype = x_ref.dtype  # bf16 compute dtype

    # Input layer: fcI -> tanh (f32 MXU accumulation, f32 bias add, bf16 tanh on v6e/v7x).
    h = jnp.dot(x_ref[...], wi_ref[...], preferred_element_type=jnp.float32) + bi_ref[...]
    act = jnp.tanh(h.astype(tanh_dtype)).astype(act_dtype)

    if num_hidden_layers > 0:
        def body(l, act):
            hl = jnp.dot(act, wh_ref[l], preferred_element_type=jnp.float32) + bh_ref[l]
            return jnp.tanh(hl.astype(tanh_dtype)).astype(act_dtype)
        act = lax.fori_loop(0, num_hidden_layers, body, act, unroll=True)

    # Output layer: fco, no activation.
    o_ref[...] = (jnp.dot(act, wo_ref[...], preferred_element_type=jnp.float32)
                  + bo_ref[...]).astype(o_ref.dtype)


def _mlp_kernel_streamed(x_ref, wi_ref, bi_ref, *rest, num_hidden_layers, tanh_dtype):
    """Weight-streaming fallback; grid = (num_batch_tiles, layer_steps).

    CORRECTNESS: the layer axis MUST stay the LAST grid axis and be marked 'arbitrary'
    (act_ref is written at l == 0 before any read and carried across layer steps).
    """
    if num_hidden_layers > 0:
        wh_ref, bh_ref, wo_ref, bo_ref, o_ref, act_ref = rest
    else:
        wo_ref, bo_ref, o_ref, act_ref = rest

    l = pl.program_id(1)

    @pl.when(l == 0)
    def _():
        h = jnp.dot(x_ref[...], wi_ref[...], preferred_element_type=jnp.float32) + bi_ref[...]
        act_ref[...] = jnp.tanh(h.astype(tanh_dtype)).astype(act_ref.dtype)

    if num_hidden_layers > 0:  # static compile-time constant
        h = jnp.dot(act_ref[...], wh_ref[...], preferred_element_type=jnp.float32) + bh_ref[...]
        act_ref[...] = jnp.tanh(h.astype(tanh_dtype)).astype(act_ref.dtype)

    @pl.when(l == pl.num_programs(1) - 1)
    def _():
        o_ref[...] = (jnp.dot(act_ref[...], wo_ref[...], preferred_element_type=jnp.float32)
                      + bo_ref[...]).astype(o_ref.dtype)


# ----------------------------------------------------------------------------
# One-time parameter pre-pack (hoisted out of the per-call forward path)
# ----------------------------------------------------------------------------

def prepack_params(wi, bi, wh, bh, wo, bo, weight_dtype=jnp.bfloat16):
    """Pad feature dims to multiples of 128 and cast weights to bf16 (do this ONCE)."""
    in_size, hidden = wi.shape
    out_size = wo.shape[1]
    num_layers = wh.shape[0]

    in_p = _round_up(in_size, LANE)
    h_p = _round_up(hidden, LANE)
    out_p = _round_up(out_size, LANE)

    f32 = jnp.float32
    wi_p = jnp.pad(wi, ((0, in_p - in_size), (0, h_p - hidden))).astype(weight_dtype)
    bi_p = jnp.pad(bi.reshape(1, hidden), ((0, 0), (0, h_p - hidden))).astype(f32)
    wo_p = jnp.pad(wo, ((0, h_p - hidden), (0, out_p - out_size))).astype(weight_dtype)
    bo_p = jnp.pad(bo.reshape(1, out_size), ((0, 0), (0, out_p - out_size))).astype(f32)
    if num_layers > 0:
        wh_p = jnp.pad(wh, ((0, 0), (0, h_p - hidden), (0, h_p - hidden))).astype(weight_dtype)
        bh_p = jnp.pad(bh.reshape(num_layers, 1, hidden),
                       ((0, 0), (0, 0), (0, h_p - hidden))).astype(f32)
    else:
        wh_p = jnp.zeros((0, h_p, h_p), weight_dtype)   # never passed to the kernel
        bh_p = jnp.zeros((0, 1, h_p), f32)

    packed = (wi_p, bi_p, wh_p, bh_p, wo_p, bo_p)
    meta = dict(out_size=out_size, num_layers=num_layers)
    return packed, meta


# ----------------------------------------------------------------------------
# Forward
# ----------------------------------------------------------------------------

def simple_nn_forward(x, wi_p, bi_p, wh_p, bh_p, wo_p, bo_p, *,
                      out_size, num_layers, tile_m=None, force_streaming=False):
    """Fused SimpleNN forward pass on pre-packed weights; returns (B, out_size) float32."""
    B, in_size = x.shape
    in_p, h_p = wi_p.shape
    out_p = wo_p.shape[1]
    compute_dtype = wi_p.dtype  # bf16

    gen = _tpu_generation()
    budget = _vmem_budget_bytes(gen)
    # bf16 tanh on v6e/v7x (bf16 EUP); keep f32 tanh on v5e / unknown.
    tanh_dtype = jnp.bfloat16 if gen in (6, 7) else jnp.float32

    # ---- batch tile ---------------------------------------------------------
    tm = 512 if tile_m is None else tile_m            # >= ~330 hides the streamed Wh DMA
    tm = min(_round_up(tm, SUBLANE_BF16), _round_up(B, SUBLANE_BF16))
    # v7x has 2 TensorCores and only the batch axis is 'parallel': guarantee >= 2 tiles.
    if gen >= 7 and _round_up(B, tm) == tm and B >= 2 * SUBLANE_BF16:
        tm = _round_up((B + 1) // 2, SUBLANE_BF16)

    weight_bytes = (wi_p.nbytes + bi_p.nbytes + wh_p.nbytes + bh_p.nbytes
                    + wo_p.nbytes + bo_p.nbytes)
    resident = (not force_streaming) and (weight_bytes <= budget // 2)

    if resident:
        def working_set(t):  # weights (pessimistically x2) + double-buffered x/out tiles + slack
            return 2 * weight_bytes + 2 * t * in_p * 2 + 2 * t * out_p * 4 + 4 * t * h_p
    else:
        def working_set(t):  # double-buffered per-step blocks + activation carry
            return (2 * (t * in_p * 2 + in_p * h_p * 2 + h_p * 4
                         + h_p * h_p * 2 + h_p * 4
                         + h_p * out_p * 2 + out_p * 4
                         + t * out_p * 4)
                    + t * h_p * 2)

    while tm > SUBLANE_BF16 and working_set(tm) > budget:
        tm = _round_up(tm // 2, SUBLANE_BF16)
    # TODO(synk): for h_p >~ 3072 on v7x (double-buffered Wh alone ~64 MiB) an N/K tile
    # axis over Wh would be needed; not implemented here.

    B_p = _round_up(B, tm)
    n_batch_tiles = B_p // tm

    # Only the activation tensor is padded/cast per call; weights were pre-packed once.
    x_p = jnp.pad(x, ((0, B_p - B), (0, in_p - in_size))).astype(compute_dtype)

    # Advisory cost estimate for XLA's scheduler.
    flops = 2 * B_p * (in_p * h_p + num_layers * h_p * h_p + h_p * out_p)
    transcendentals = B_p * h_p * (num_layers + 1)
    bytes_accessed = int(x_p.nbytes + weight_bytes * (1 if resident else n_batch_tiles)
                         + B_p * out_p * 4)

    if resident:
        # ---- weight-resident path: grid over batch tiles only ---------------
        grid = (n_batch_tiles,)
        in_specs = [pl.BlockSpec((tm, in_p), lambda i: (i, 0)),        # x tile
                    pl.BlockSpec((in_p, h_p), lambda i: (0, 0)),       # Wi  (resident)
                    pl.BlockSpec((1, h_p), lambda i: (0, 0))]          # bi
        args = [x_p, wi_p, bi_p]
        if num_layers > 0:
            in_specs += [pl.BlockSpec((num_layers, h_p, h_p), lambda i: (0, 0, 0)),  # all Wh
                         pl.BlockSpec((num_layers, 1, h_p), lambda i: (0, 0, 0))]    # all bh
            args += [wh_p, bh_p]
        in_specs += [pl.BlockSpec((h_p, out_p), lambda i: (0, 0)),     # Wo
                     pl.BlockSpec((1, out_p), lambda i: (0, 0))]       # bo
        args += [wo_p, bo_p]
        out_specs = pl.BlockSpec((tm, out_p), lambda i: (i, 0))
        scratch = ()
        dims = ("parallel",)
        kernel = functools.partial(_mlp_kernel_resident,
                                   num_hidden_layers=num_layers, tanh_dtype=tanh_dtype)
    else:
        # ---- streaming path: layer axis LAST and 'arbitrary' ----------------
        n_layer_steps = max(num_layers, 1)
        grid = (n_batch_tiles, n_layer_steps)
        in_specs = [pl.BlockSpec((tm, in_p), lambda i, l: (i, 0)),
                    pl.BlockSpec((in_p, h_p), lambda i, l: (0, 0)),
                    pl.BlockSpec((1, h_p), lambda i, l: (0, 0))]
        args = [x_p, wi_p, bi_p]
        if num_layers > 0:
            # Squeezed layer dim: kernel sees (h_p, h_p) / (1, h_p) directly (no 3-D slice).
            in_specs += [pl.BlockSpec((pl.Squeezed(), h_p, h_p), lambda i, l: (l, 0, 0)),
                         pl.BlockSpec((pl.Squeezed(), 1, h_p), lambda i, l: (l, 0, 0))]
            args += [wh_p, bh_p]
        in_specs += [pl.BlockSpec((h_p, out_p), lambda i, l: (0, 0)),
                     pl.BlockSpec((1, out_p), lambda i, l: (0, 0))]
        args += [wo_p, bo_p]
        out_specs = pl.BlockSpec((tm, out_p), lambda i, l: (i, 0))
        scratch = (pltpu.VMEM((tm, h_p), compute_dtype),)  # activation carry across layer steps
        dims = ("parallel", "arbitrary")
        kernel = functools.partial(_mlp_kernel_streamed,
                                   num_hidden_layers=num_layers, tanh_dtype=tanh_dtype)

    out_padded = pl.pallas_call(
        kernel,
        out_shape=jax.ShapeDtypeStruct((B_p, out_p), jnp.float32),
        grid_spec=pltpu.PrefetchScalarGridSpec(
            num_scalar_prefetch=0,
            grid=grid,
            in_specs=in_specs,
            out_specs=out_specs,
            scratch_shapes=scratch),
        compiler_params=pltpu.CompilerParams(
            dimension_semantics=dims,
            vmem_limit_bytes=int(budget)),
        cost_estimate=pl.CostEstimate(
            flops=flops,
            transcendentals=transcendentals,
            bytes_accessed=bytes_accessed),
    )(*args)

    return out_padded[:B, :out_size]


# ----------------------------------------------------------------------------
# Init / reference
# ----------------------------------------------------------------------------

def init_params(key, input_size, hidden_size, num_layers, output_size):
    """Deterministic synthetic init (uniform fan-in scaling, like PyTorch default)."""
    ks = jax.random.split(key, 6)

    def unif(k, shape, fan_in):
        bound = 1.0 / jnp.sqrt(fan_in)
        return jax.random.uniform(k, shape, jnp.float32, -bound, bound)

    wi = unif(ks[0], (input_size, hidden_size), input_size)
    bi = unif(ks[1], (1, hidden_size), input_size)
    wh = unif(ks[2], (num_layers, hidden_size, hidden_size), hidden_size)
    bh = unif(ks[3], (num_layers, 1, hidden_size), hidden_size)
    wo = unif(ks[4], (hidden_size, output_size), hidden_size)
    bo = unif(ks[5], (1, output_size), hidden_size)
    return wi, bi, wh, bh, wo, bo


def reference_forward(x, wi, bi, wh, bh, wo, bo):
    out = jnp.tanh(x @ wi + bi)
    for l in range(wh.shape[0]):
        out = jnp.tanh(out @ wh[l] + bh[l])
    return out @ wo + bo


if __name__ == "__main__":
    # Small shapes consistent with the module's forward.
    batch = 8
    input_size = 16
    hidden_size = 32
    num_layers = 2
    output_size = 8

    key = jax.random.PRNGKey(0)
    kx, kp = jax.random.split(key)
    x = jax.random.normal(kx, (batch, input_size), jnp.float32)
    params = init_params(kp, input_size, hidden_size, num_layers, output_size)

    # One-time weight pre-pack (pad + bf16 cast) hoisted out of the per-call forward path.
    packed, meta = prepack_params(*params)

    y_ref = reference_forward(x, *params)

    # Weight-resident path (default for small/medium weight sets).
    fwd = jax.jit(functools.partial(simple_nn_forward, **meta))
    y = jax.block_until_ready(fwd(x, *packed))
    assert y.shape == (batch, output_size)
    # bf16 matmul operands (+ bf16 tanh on v6e/v7x) with f32 accumulation -> loose tolerance.
    assert jnp.allclose(y, y_ref, atol=3e-2, rtol=3e-2), float(jnp.max(jnp.abs(y - y_ref)))

    # Also exercise the weight-streaming fallback path (layer grid axis).
    fwd_stream = jax.jit(functools.partial(simple_nn_forward, force_streaming=True, **meta))
    y2 = jax.block_until_ready(fwd_stream(x, *packed))
    assert jnp.allclose(y2, y_ref, atol=3e-2, rtol=3e-2), float(jnp.max(jnp.abs(y2 - y_ref)))

    print("KERNEL_OK")
</pallas_src>

<mosaic_0001>
module attributes {stable_mosaic.version = 11 : i64} {
  func.func @_mlp_kernel_resident(%arg0: i32, %arg1: memref<16x128xbf16, #tpu.memory_space<vmem>>, %arg2: memref<128x128xbf16, #tpu.memory_space<vmem>>, %arg3: memref<1x128xf32, #tpu.memory_space<vmem>>, %arg4: memref<2x128x128xbf16, #tpu.memory_space<vmem>>, %arg5: memref<2x1x128xf32, #tpu.memory_space<vmem>>, %arg6: memref<128x128xbf16, #tpu.memory_space<vmem>>, %arg7: memref<1x128xf32, #tpu.memory_space<vmem>>, %arg8: memref<16x128xf32, #tpu.memory_space<vmem>>) attributes {dimension_semantics = [#tpu.dimension_semantics<parallel>], iteration_bounds = array<i64: 1>, scalar_prefetch = 0 : i64, scratch_operands = 0 : i64, tpu.core_type = #tpu.core_type<tc>, window_params = [{transform_indices = @transform_0, window_bounds = array<i64: 16, 128>}, {pipeline_mode = #tpu.pipeline_mode<synchronous>, transform_indices = @transform_1, window_bounds = array<i64: 128, 128>}, {pipeline_mode = #tpu.pipeline_mode<synchronous>, transform_indices = @transform_2, window_bounds = array<i64: 1, 128>}, {pipeline_mode = #tpu.pipeline_mode<synchronous>, transform_indices = @transform_3, window_bounds = array<i64: 2, 128, 128>}, {pipeline_mode = #tpu.pipeline_mode<synchronous>, transform_indices = @transform_4, window_bounds = array<i64: 2, 1, 128>}, {pipeline_mode = #tpu.pipeline_mode<synchronous>, transform_indices = @transform_5, window_bounds = array<i64: 128, 128>}, {pipeline_mode = #tpu.pipeline_mode<synchronous>, transform_indices = @transform_6, window_bounds = array<i64: 1, 128>}, {transform_indices = @transform_7, window_bounds = array<i64: 16, 128>}]} {
    %c0 = arith.constant 0 : index
    %c0_0 = arith.constant 0 : index
    %0 = vector.load %arg1[%c0, %c0_0] : memref<16x128xbf16, #tpu.memory_space<vmem>>, vector<16x128xbf16>
    %c0_1 = arith.constant 0 : index
    %c0_2 = arith.constant 0 : index
    %1 = vector.load %arg2[%c0_1, %c0_2] : memref<128x128xbf16, #tpu.memory_space<vmem>>, vector<128x128xbf16>
    %cst = arith.constant dense<0.000000e+00> : vector<16x128xf32>
    %2 = tpu.matmul %0, %1, %cst {dimension_numbers = #tpu.dot_dimension_numbers<[1], [0], [0], [1], [0, 0, 1, 1], [], []>} : vector<16x128xbf16>, vector<128x128xbf16>, vector<16x128xf32> -> vector<16x128xf32>
    %c0_3 = arith.constant 0 : index
    %c0_4 = arith.constant 0 : index
    %3 = vector.load %arg3[%c0_3, %c0_4] : memref<1x128xf32, #tpu.memory_space<vmem>>, vector<1x128xf32>
    %4 = vector.broadcast %3 : vector<1x128xf32> to vector<16x128xf32>
    %5 = arith.addf %2, %4 : vector<16x128xf32>
    %6 = math.tanh %5 : vector<16x128xf32>
    %7 = arith.truncf %6 : vector<16x128xf32> to vector<16x128xbf16>
    %c0_i32 = arith.constant 0 : i32
    %8 = arith.index_cast %c0_i32 : i32 to index
    %c0_5 = arith.constant 0 : index
    %c0_6 = arith.constant 0 : index
    %9 = vector.load %arg4[%8, %c0_5, %c0_6] : memref<2x128x128xbf16, #tpu.memory_space<vmem>>, vector<1x128x128xbf16>
    %10 = vector.shape_cast %9 : vector<1x128x128xbf16> to vector<128x128xbf16>
    %cst_7 = arith.constant dense<0.000000e+00> : vector<16x128xf32>
    %11 = tpu.matmul %7, %10, %cst_7 {dimension_numbers = #tpu.dot_dimension_numbers<[1], [0], [0], [1], [0, 0, 1, 1], [], []>} : vector<16x128xbf16>, vector<128x128xbf16>, vector<16x128xf32> -> vector<16x128xf32>
    %12 = arith.index_cast %c0_i32 : i32 to index
    %c0_8 = arith.constant 0 : index
    %c0_9 = arith.constant 0 : index
    %13 = vector.load %arg5[%12, %c0_8, %c0_9] : memref<2x1x128xf32, #tpu.memory_space<vmem>>, vector<1x1x128xf32>
    %14 = vector.shape_cast %13 : vector<1x1x128xf32> to vector<1x128xf32>
    %15 = vector.broadcast %14 : vector<1x128xf32> to vector<16x128xf32>
    %16 = arith.addf %11, %15 : vector<16x128xf32>
    %17 = math.tanh %16 : vector<16x128xf32>
    %18 = arith.truncf %17 : vector<16x128xf32> to vector<16x128xbf16>
    %c1_i32 = arith.constant 1 : i32
    %19 = arith.index_cast %c1_i32 : i32 to index
    %c0_10 = arith.constant 0 : index
    %c0_11 = arith.constant 0 : index
    %20 = vector.load %arg4[%19, %c0_10, %c0_11] : memref<2x128x128xbf16, #tpu.memory_space<vmem>>, vector<1x128x128xbf16>
    %21 = vector.shape_cast %20 : vector<1x128x128xbf16> to vector<128x128xbf16>
    %cst_12 = arith.constant dense<0.000000e+00> : vector<16x128xf32>
    %22 = tpu.matmul %18, %21, %cst_12 {dimension_numbers = #tpu.dot_dimension_numbers<[1], [0], [0], [1], [0, 0, 1, 1], [], []>} : vector<16x128xbf16>, vector<128x128xbf16>, vector<16x128xf32> -> vector<16x128xf32>
    %23 = arith.index_cast %c1_i32 : i32 to index
    %c0_13 = arith.constant 0 : index
    %c0_14 = arith.constant 0 : index
    %24 = vector.load %arg5[%23, %c0_13, %c0_14] : memref<2x1x128xf32, #tpu.memory_space<vmem>>, vector<1x1x128xf32>
    %25 = vector.shape_cast %24 : vector<1x1x128xf32> to vector<1x128xf32>
    %26 = vector.broadcast %25 : vector<1x128xf32> to vector<16x128xf32>
    %27 = arith.addf %22, %26 : vector<16x128xf32>
    %28 = math.tanh %27 : vector<16x128xf32>
    %29 = arith.truncf %28 : vector<16x128xf32> to vector<16x128xbf16>
    %c2_i32 = arith.constant 2 : i32
    %c0_15 = arith.constant 0 : index
    %c0_16 = arith.constant 0 : index
    %30 = vector.load %arg6[%c0_15, %c0_16] : memref<128x128xbf16, #tpu.memory_space<vmem>>, vector<128x128xbf16>
    %cst_17 = arith.constant dense<0.000000e+00> : vector<16x128xf32>
    %31 = tpu.matmul %29, %30, %cst_17 {dimension_numbers = #tpu.dot_dimension_numbers<[1], [0], [0], [1], [0, 0, 1, 1], [], []>} : vector<16x128xbf16>, vector<128x128xbf16>, vector<16x128xf32> -> vector<16x128xf32>
    %c0_18 = arith.constant 0 : index
    %c0_19 = arith.constant 0 : index
    %32 = vector.load %arg7[%c0_18, %c0_19] : memref<1x128xf32, #tpu.memory_space<vmem>>, vector<1x128xf32>
    %33 = vector.broadcast %32 : vector<1x128xf32> to vector<16x128xf32>
    %34 = arith.addf %31, %33 : vector<16x128xf32>
    %c0_20 = arith.constant 0 : index
    %c0_21 = arith.constant 0 : index
    %35 = vector.load %arg8[%c0_20, %c0_21] : memref<16x128xf32, #tpu.memory_space<vmem>>, vector<16x128xf32>
    tpu.vector_store %arg8[%c0_20, %c0_21], %34 {strides = array<i32>} : memref<16x128xf32, #tpu.memory_space<vmem>>, vector<16x128xf32>,
    return
  }
  func.func @transform_0(%arg0: i32) -> (i32, i32) {
    %c0_i32 = arith.constant 0 : i32
    %c0_i32_0 = arith.constant 0 : i32
    return %arg0, %c0_i32 : i32, i32
  }
  func.func @transform_1(%arg0: i32) -> (i32, i32) {
    %c0_i32 = arith.constant 0 : i32
    %c0_i32_0 = arith.constant 0 : i32
    %c0_i32_1 = arith.constant 0 : i32
    return %c0_i32, %c0_i32_0 : i32, i32
  }
  func.func @transform_2(%arg0: i32) -> (i32, i32) {
    %c0_i32 = arith.constant 0 : i32
    %c0_i32_0 = arith.constant 0 : i32
    %c0_i32_1 = arith.constant 0 : i32
    return %c0_i32, %c0_i32_0 : i32, i32
  }
  func.func @transform_3(%arg0: i32) -> (i32, i32, i32) {
    %c0_i32 = arith.constant 0 : i32
    %c0_i32_0 = arith.constant 0 : i32
    %c0_i32_1 = arith.constant 0 : i32
    %c0_i32_2 = arith.constant 0 : i32
    return %c0_i32, %c0_i32_0, %c0_i32_1 : i32, i32, i32
  }
  func.func @transform_4(%arg0: i32) -> (i32, i32, i32) {
    %c0_i32 = arith.constant 0 : i32
    %c0_i32_0 = arith.constant 0 : i32
    %c0_i32_1 = arith.constant 0 : i32
    %c0_i32_2 = arith.constant 0 : i32
    return %c0_i32, %c0_i32_0, %c0_i32_1 : i32, i32, i32
  }
  func.func @transform_5(%arg0: i32) -> (i32, i32) {
    %c0_i32 = arith.constant 0 : i32
    %c0_i32_0 = arith.constant 0 : i32
    %c0_i32_1 = arith.constant 0 : i32
    return %c0_i32, %c0_i32_0 : i32, i32
  }
  func.func @transform_6(%arg0: i32) -> (i32, i32) {
    %c0_i32 = arith.constant 0 : i32
    %c0_i32_0 = arith.constant 0 : i32
    %c0_i32_1 = arith.constant 0 : i32
    return %c0_i32, %c0_i32_0 : i32, i32
  }
  func.func @transform_7(%arg0: i32) -> (i32, i32) {
    %c0_i32 = arith.constant 0 : i32
    %c0_i32_0 = arith.constant 0 : i32
    return %arg0, %c0_i32 : i32, i32
  }
}

</mosaic_0001>

<bundles_post_ra>
// kernel: simple_nn_forward.1
= control target key start
LH: loop header
LB: loop body
LE: loop exit
PB: predicated region body
PF: predicated region fallthrough
CT: control target
= control target key end

     0   :  { %12 = vsyncpa [#allocation3], 0  ;;  %s766_s0 = inlined_call_operand.vmem [shape: bf16[16,128], index: 0, kind: input, shape index: {}]   ;;  %s767_s1 = inlined_call_operand.hbm [shape: bf16[128,128], index: 1, kind: input, shape index: {}]   ;;  %s768_s2 = inlined_call_operand.vmem [shape: f32[1,128], index: 2, kind: input, shape index: {}]   ;;  %s769_s3 = inlined_call_operand.hbm [shape: bf16[2,128,128], index: 3, kind: input, shape index: {}]   ;;  %s770_s4 = inlined_call_operand.vmem [shape: f32[2,1,128], index: 4, kind: input, shape index: {}]   ;;  %s771_s5 = inlined_call_operand.hbm [shape: bf16[128,128], index: 5, kind: input, shape index: {}]   ;;  %s772_s6 = inlined_call_operand.vmem [shape: f32[1,128], index: 6, kind: input, shape index: {}]   ;;  %s773_s7 = inlined_call_operand.vmem [shape: f32[16,128], index: 7, kind: output, shape index: {}]  }
   0x1   :  { %13 = vsyncpa [#allocation5], 0  ;;  %s35_s26 = sshll.u32 %s769_s3, 4  ;;  %s691_s27 = smov [#allocation4]   ;;  %s36_s26 = int_to_ptr.hbm [resolvable:$true] %s35_s26 }
   0x2   :  { %s37_s28 = sshll.u32 %s691_s27, 4  ;;  %s20_s8 = sshll.u32 %s767_s1, 4  ;;  %s38_s28 = int_to_ptr.vmem [resolvable:$true] %s37_s28  ;;  %s21_s8 = int_to_ptr.hbm [resolvable:$true] %s20_s8 }
   0x3   :  { %s692_s9 = smov 64   ;;  %s693_s10 = smov 4  }
   0x4   :  { %43 = dma.hbm_to_vmem [thread:$0]  %s36_s26, 2048, %s38_s28, [#allocation5], %s692_s9, %s692_s9, %s693_s10  }
   0x5   :  { %s694_s11 = smov [#allocation2]   ;;  %s50_s15 = sshll.u32 %s771_s5, 4  ;;  %s51_s15 = int_to_ptr.hbm [resolvable:$true] %s50_s15 }
   0x6   :  { %s22_s12 = sshll.u32 %s694_s11, 4  ;;  %s695_s3 = smov [#allocation6]   ;;  %s23_s12 = int_to_ptr.vmem [resolvable:$true] %s22_s12 }
   0x7   :  { %28 = dma.hbm_to_vmem [thread:$0]  %s21_s8, 1024, %s23_s12, [#allocation3], %s692_s9, %s692_s9, %s693_s10  }
   0x8   :  { %s52_s16 = sshll.u32 %s695_s3, 4  ;;  %s53_s16 = int_to_ptr.vmem [resolvable:$true] %s52_s16 }
   0x9   :  { %58 = dma.hbm_to_vmem [thread:$0]  %s51_s15, 1024, %s53_s16, [#allocation5], %s692_s9, %s692_s9, %s693_s10  }
   0xa   :  { %687 = dma.done.wait [#allocation3], 1024  }
   0xb   :  { %688 = vsyncadd [#allocation3], 4294966272 }
   0xc   :  { %689 = dma.done.wait [#allocation5], 3072  }
   0xd   :  { %690 = vsyncadd [#allocation5], 4294964224  ;;  %v569_v0 = vld [vmem:[#allocation2 + $0x38] sm:$0xff]  ;;  %v568_v1 = vld [vmem:[#allocation2 + $0x30] sm:$0xff] }
   0xe   :  { %149 = vmatpush.bf16.msra.mxu0 %v569_v0  ;;  %v577_v2 = vld [vmem:[#allocation4 + $0x38] sm:$0xff]  ;;  %v576_v3 = vld [vmem:[#allocation4 + $0x30] sm:$0xff]  ;;  %v567_v4 = vld [vmem:[#allocation2 + $0x28] sm:$0xff] }
   0xf   :  { %234 = vmatpush.bf16.msra.mxu1 %v577_v2  ;;  %v575_v5 = vld [vmem:[#allocation4 + $0x28] sm:$0xff]  ;;  %v566_v6 = vld [vmem:[#allocation2 + $0x20] sm:$0xff]  ;;  %v565_v7 = vld [vmem:[#allocation2 + $0x18] sm:$0xff] }
  0x10   :  { %v564_v8 = vld [vmem:[#allocation2 + $0x10] sm:$0xff]  ;;  %v563_v9 = vld [vmem:[#allocation2 + $0x8] sm:$0xff]  ;;  %v562_v10 = vld [vmem:[#allocation2] sm:$0xff] }
  0x11   :  { %v561_v11 = vld [vmem:[%s766_s0] sm:$0xff]  ;;  %v573_v13 = vld [vmem:[#allocation4 + $0x18] sm:$0xff]  ;;  %v572_v14 = vld [vmem:[#allocation4 + $0x10] sm:$0xff] }
  0x12   :  { %150 = vmatpush.bf16.msra.mxu0 %v568_v1  ;;  %v574_v12 = vld [vmem:[#allocation4 + $0x20] sm:$0xff]  ;;  %v571_v15 = vld [vmem:[#allocation4 + $0x8] sm:$0xff]  ;;  %v585_v17 = vld [vmem:[#allocation4 + $0x78] sm:$0xff] }
  0x13   :  { %235 = vmatpush.bf16.msra.mxu1 %v576_v3  ;;  %v570_v16 = vld [vmem:[#allocation4] sm:$0xff]  ;;  %321 = vmatpush.bf16.msra.mxu2 %v585_v17  ;;  %v584_v18 = vld [vmem:[#allocation4 + $0x70] sm:$0xff]  ;;  %v583_v19 = vld [vmem:[#allocation4 + $0x68] sm:$0xff] }
  0x14   :  { %v599_v21 = vld [vmem:[%s768_s2] ss:$0 sm:$0xff]  ;;  %v581_v29 = vld [vmem:[#allocation4 + $0x58] sm:$0xff]  ;;  %v580_v30 = vld [vmem:[#allocation4 + $0x50] sm:$0xff] }
  0x15   :  { %v582_v28 = vld [vmem:[#allocation4 + $0x60] sm:$0xff]  ;;  %v579_v31 = vld [vmem:[#allocation4 + $0x48] sm:$0xff]  ;;  %v593_v33 = vld [vmem:[#allocation6 + $0x38] sm:$0xff] }
  0x16   :  { %151 = vmatpush.bf16.msra.mxu0 %v567_v4  ;;  %v578_v32 = vld [vmem:[#allocation4 + $0x40] sm:$0xff]  ;;  %406 = vmatpush.bf16.msra.mxu3 %v593_v33  ;;  %v592_v34 = vld [vmem:[#allocation6 + $0x30] sm:$0xff]  ;;  %v591_v35 = vld [vmem:[#allocation6 + $0x28] sm:$0xff] }
  0x17   :  { %236 = vmatpush.bf16.msra.mxu1 %v575_v5  ;;  %322 = vmatpush.bf16.msra.mxu2 %v584_v18  ;;  %v600_v37 = vld [vmem:[%s770_s4] ss:$0 sm:$0xff]  ;;  %v589_v45 = vld [vmem:[#allocation6 + $0x18] sm:$0xff]  ;;  %v588_v46 = vld [vmem:[#allocation6 + $0x10] sm:$0xff] }
  0x18   :  { %v590_v44 = vld [vmem:[#allocation6 + $0x20] sm:$0xff]  ;;  %v587_v47 = vld [vmem:[#allocation6 + $0x8] sm:$0xff] }
  0x19   :  { %v586_v48 = vld [vmem:[#allocation6] sm:$0xff] }
  0x1a   :  { %152 = vmatpush.bf16.msra.mxu0 %v566_v6  ;;  %407 = vmatpush.bf16.msra.mxu3 %v592_v34  ;;  %v601_v50 = vld [vmem:[%s770_s4 + $0x1] ss:$0 sm:$0xff]  ;;  %v602_v57 = vld [vmem:[%s772_s6] ss:$0 sm:$0xff] }
  0x1b   :  { %237 = vmatpush.bf16.msra.mxu1 %v574_v12  ;;  %323 = vmatpush.bf16.msra.mxu2 %v583_v19 }
  0x1e   :  { %153 = vmatpush.bf16.msra.mxu0 %v565_v7  ;;  %408 = vmatpush.bf16.msra.mxu3 %v591_v35 }
  0x1f   :  { %238 = vmatpush.bf16.msra.mxu1 %v573_v13  ;;  %324 = vmatpush.bf16.msra.mxu2 %v582_v28 }
  0x22   :  { %154 = vmatpush.bf16.msra.mxu0 %v564_v8  ;;  %409 = vmatpush.bf16.msra.mxu3 %v590_v44 }
  0x23   :  { %239 = vmatpush.bf16.msra.mxu1 %v572_v14  ;;  %325 = vmatpush.bf16.msra.mxu2 %v581_v29 }
  0x26   :  { %155 = vmatpush.bf16.msra.mxu0 %v563_v9  ;;  %410 = vmatpush.bf16.msra.mxu3 %v589_v45 }
  0x27   :  { %240 = vmatpush.bf16.msra.mxu1 %v571_v15  ;;  %326 = vmatpush.bf16.msra.mxu2 %v580_v30 }
  0x2a   :  { %156 = vmatpush.bf16.msra.mxu0 %v562_v10  ;;  %411 = vmatpush.bf16.msra.mxu3 %v588_v46 }
  0x2b   :  { %241 = vmatpush.bf16.msra.mxu1 %v570_v16  ;;  %327 = vmatpush.bf16.msra.mxu2 %v579_v31 }
  0x2d   :  { %157 = vmatmul.bf16.vlgmr.msra.gmra.mxu0 %v561_v11 }
  0x2e   :  { %412 = vmatpush.bf16.msra.mxu3 %v587_v47 }
  0x2f   :  { %328 = vmatpush.bf16.msra.mxu2 %v578_v32 }
  0x32   :  { %413 = vmatpush.bf16.msra.mxu3 %v586_v48 }
  0xaa   :  { %v158_v20 = vpop.f32.mrf.mxu0 }
  0xab   :  { %v159_v22 = vadd.f32 %v599_v21, %v158_v20 }
  0xad   :  { %603 = vtanh.f32 %v159_v22 }
  0xb2   :  { %v160_v23 = vpop.f32.mrf.mxu0 }
  0xb3   :  { %v161_v24 = vadd.f32 %v599_v21, %v160_v23  ;;  %v604_v25 = vpop.eup %603 }
  0xb5   :  { %605 = vtanh.f32 %v161_v24 }
  0xbb   :  { %v606_v26 = vpop.eup %605 }
  0xbc   :  { %v165_v27 = vpack.c.bf16 %v606_v26, %v604_v25 }
  0xbe   :  { %242 = vmatmul.bf16.vlgmr.msra.gmra.mxu1 %v165_v27 }
 0x13b   :  { %v243_v36 = vpop.f32.mrf.mxu1 }
 0x13c   :  { %v244_v38 = vadd.f32 %v600_v37, %v243_v36 }
 0x13e   :  { %607 = vtanh.f32 %v244_v38 }
 0x143   :  { %v245_v39 = vpop.f32.mrf.mxu1 }
 0x144   :  { %v246_v40 = vadd.f32 %v600_v37, %v245_v39  ;;  %v608_v41 = vpop.eup %607 }
 0x146   :  { %609 = vtanh.f32 %v246_v40 }
 0x14c   :  { %v610_v42 = vpop.eup %609 }
 0x14d   :  { %v250_v43 = vpack.c.bf16 %v610_v42, %v608_v41 }
 0x14f   :  { %329 = vmatmul.bf16.vlgmr.msra.gmra.mxu2 %v250_v43 }
 0x1d2   :  { %v330_v49 = vpop.f32.mrf.mxu2 }
 0x1d3   :  { %v331_v51 = vadd.f32 %v601_v50, %v330_v49 }
 0x1d5   :  { %611 = vtanh.f32 %v331_v51 }
 0x1da   :  { %v332_v52 = vpop.f32.mrf.mxu2 }
 0x1db   :  { %v333_v53 = vadd.f32 %v601_v50, %v332_v52  ;;  %v612_v54 = vpop.eup %611 }
 0x1dd   :  { %613 = vtanh.f32 %v333_v53 }
 0x1e3   :  { %v614_v55 = vpop.eup %613 }
 0x1e4   :  { %v337_v56 = vpack.c.bf16 %v614_v55, %v612_v54 }
 0x1e6   :  { %414 = vmatmul.bf16.vlgmr.msra.gmra.mxu3 %v337_v56 }
 0x269   :  { %v415_v58 = vpop.f32.mrf.mxu3 }
 0x26a   :  { %v416_v59 = vadd.f32 %v602_v57, %v415_v58 }
 0x26c   :  { %420 = vst [vmem:[%s773_s7] sm:$0xff] %v416_v59 }
 0x271   :  { %v417_v60 = vpop.f32.mrf.mxu3 }
 0x272   :  { %v418_v61 = vadd.f32 %v602_v57, %v417_v60 }
 0x274   :  { %421 = vst [vmem:[%s773_s7 + $0x8] sm:$0xff] %v418_v61 }
 0x275   :  { %426 = vsyncpa [#allocation3], 1 }
 0x276   :  { %427 = vsyncpa [#allocation5], 1 }

</bundles_post_ra>
